<compile_context>
chip_gen: v5e
topology: v5e:2x2
jax: 0.10.0
libtpu: 0.0.40
codegen_flags: <defaults>
</compile_context>

<pallas_src>
import jax
import jax.numpy as jnp
from jax.experimental import pallas as pl
from jax.experimental.pallas import tpu as pltpu


_LANES = 128
_THRESH = 0.008856  # (6/29)^3, OpenCV's Lab linear-range threshold

# RGB (uint8 counts 0..255) -> whitepoint-normalized XYZ coefficients, with the
# /255 and the D65 whitepoint divides (0.950456, 1.088754) folded in.
_XR = 0.412453 / (0.950456 * 255.0)
_XG = 0.357580 / (0.950456 * 255.0)
_XB = 0.180423 / (0.950456 * 255.0)
_YR = 0.212671 / 255.0
_YG = 0.715160 / 255.0
_YB = 0.072169 / 255.0
_ZR = 0.019334 / (1.088754 * 255.0)
_ZG = 0.119193 / (1.088754 * 255.0)
_ZB = 0.950227 / (1.088754 * 255.0)


def _quantize_u8(x):
    """[-1,1] -> clamp -> truncating uint8 quantization, kept as 0..255 floats.

    Constants folded: floor(clip((x+1)*0.5,0,1)*255) == floor(clip(x*127.5+127.5,0,255)).
    """
    return jnp.floor(jnp.clip(x * 127.5 + 127.5, 0.0, 255.0))


def _cbrt(t):
    """Cube root for t >= 0 on the EUP (exp/log), keeping the VALU slot free.

    2 EUP ops + 1 VALU mul per cbrt; hides under the remaining VALU work since
    the EUP is otherwise idle in this kernel.  t == 0 -> exp(-inf) == 0, no NaN.
    """
    return jnp.exp(jnp.log(t) * (1.0 / 3.0))


def _rgb_to_lab_u8(r, g, b):
    """OpenCV COLOR_RGB2Lab for 8-bit images (analytic formula).

    r, g, b are uint8-valued float32 arrays (0..255).
    """
    x = _XR * r + _XG * g + _XB * b      # X / Xn
    y = _YR * r + _YG * g + _YB * b      # Y
    z = _ZR * r + _ZG * g + _ZB * b      # Z / Zn

    fx = jnp.where(x > _THRESH, _cbrt(x), 7.787 * x + 16.0 / 116.0)
    fy = jnp.where(y > _THRESH, _cbrt(y), 7.787 * y + 16.0 / 116.0)
    fz = jnp.where(z > _THRESH, _cbrt(z), 7.787 * z + 16.0 / 116.0)

    # Reuse fy (= cbrt(y) on the >thresh branch): no extra cbrt for L.
    L = jnp.where(y > _THRESH, 116.0 * fy - 16.0, 903.3 * y)
    a = 500.0 * (fx - fy) + 128.0
    bb = 200.0 * (fy - fz) + 128.0

    # 8-bit output scaling + saturate_cast.  L*(255/100) is already in [0,255]
    # for valid inputs -> no clip on L8.
    L8 = jnp.round(L * (255.0 / 100.0))
    a8 = jnp.clip(jnp.round(a), 0.0, 255.0)
    b8 = jnp.clip(jnp.round(bb), 0.0, 255.0)
    return L8, a8, b8


def _make_kernel(rows_valid, tile_r, tiles_per_half, needs_mask):
    """One (batch, spatial-half, spatial-tile) grid step.

    pred_ref / ref_ref: (1, 3, tile_r, 128) lane-dense blocks.
    out_ref:            (1, 1, 1, 128) per-(batch, half) lane-wise partial-sum
                        block, resident across the last ("arbitrary") grid axis.
    """
    def kernel(pred_ref, ref_ref, out_ref):
        s = pl.program_id(2)

        @pl.when(s == 0)
        def _():
            out_ref[...] = jnp.zeros_like(out_ref)

        p = pred_ref[...].astype(jnp.float32)   # (1, 3, tile_r, 128)
        q = ref_ref[...].astype(jnp.float32)

        pL, pa, pb = _rgb_to_lab_u8(_quantize_u8(p[0, 0]),
                                    _quantize_u8(p[0, 1]),
                                    _quantize_u8(p[0, 2]))
        rL, ra, rb = _rgb_to_lab_u8(_quantize_u8(q[0, 0]),
                                    _quantize_u8(q[0, 1]),
                                    _quantize_u8(q[0, 2]))

        abs_diff = jnp.abs(pL - rL) + jnp.abs(pa - ra) + jnp.abs(pb - rb)  # (tile_r, 128)

        if needs_mask:
            # Zero the rows beyond the valid flattened-HW extent (tail of the
            # last real tile, plus any clamped duplicate tiles).  where-select
            # also discards any NaN/garbage produced from out-of-bounds data.
            h = pl.program_id(1)
            row_start = (h * tiles_per_half + s) * tile_r
            row_ids = jax.lax.broadcasted_iota(jnp.int32, abs_diff.shape, 0)
            abs_diff = jnp.where(row_ids + row_start < rows_valid, abs_diff, 0.0)

        # Lane-wise partial sum only (sublane reduce = XLU, idle unit); the tiny
        # cross-lane reduce + (loss_weight / (3*HW*B)) scaling happens in JAX.
        out_ref[...] += jnp.sum(abs_diff, axis=0, keepdims=True)[None, None]

    return kernel


def color_correction_loss(pred, ref, loss_weight=1.0):
    """pred, ref: (B, 3, H, W) in [-1, 1] (f32 or bf16). Returns scalar float32."""
    B, C, H, W = pred.shape
    assert C == 3, "ColorCorrectionLoss expects RGB (C == 3)"
    HW = H * W

    # Lane-dense flattened-spatial layout (B, 3, rows, 128); pad only up to the
    # next multiple of 128 (no padding copy at all when HW % 128 == 0).
    rows = pl.cdiv(HW, _LANES)
    pad = rows * _LANES - HW

    itemsize = jnp.dtype(pred.dtype).itemsize
    sub = 16 if itemsize < 4 else 8     # sublane multiple for the block
    cap = 512                           # tile_r cap (sublanes)

    if rows <= cap:
        if rows >= 2 * sub:
            # Split into two tiles so the spatial "half" axis can feed both
            # v7x TensorCores even when B == 1.
            tile_r = pl.cdiv(pl.cdiv(rows, 2), sub) * sub
        else:
            tile_r = rows               # single full-extent block
    else:
        tile_r = cap
    n_tiles = pl.cdiv(rows, tile_r)

    n_halves = 2 if n_tiles >= 2 else 1
    tiles_per_half = pl.cdiv(n_tiles, n_halves)
    covered_rows = n_halves * tiles_per_half * tile_r
    needs_mask = covered_rows > rows
    needs_clamp = n_halves * tiles_per_half > n_tiles

    def _prep(x):
        x = x.reshape(B, C, HW)
        if pad:
            # pred and ref padded with the SAME constant -> identical Lab
            # values -> padded pixels contribute exactly 0 to the |diff| sum.
            x = jnp.pad(x, ((0, 0), (0, 0), (0, pad)), constant_values=-1.0)
        return x.reshape(B, C, rows, _LANES)

    pred_t = _prep(pred)
    ref_t = _prep(ref)

    if needs_clamp:
        def in_map(b, h, s):
            sg = jnp.minimum(h * tiles_per_half + s, n_tiles - 1)
            return (b, 0, sg, 0)
    else:
        def in_map(b, h, s):
            return (b, 0, h * tiles_per_half + s, 0)

    kernel = _make_kernel(rows, tile_r, tiles_per_half, needs_mask)

    partial = pl.pallas_call(
        kernel,
        out_shape=jax.ShapeDtypeStruct((B, n_halves, 1, _LANES), jnp.float32),
        grid_spec=pltpu.PrefetchScalarGridSpec(
            num_scalar_prefetch=0,
            grid=(B, n_halves, tiles_per_half),
            in_specs=[
                pl.BlockSpec((1, C, tile_r, _LANES), in_map),
                pl.BlockSpec((1, C, tile_r, _LANES), in_map),
            ],
            out_specs=pl.BlockSpec((1, 1, 1, _LANES), lambda b, h, s: (b, h, 0, 0)),
        ),
        compiler_params=pltpu.CompilerParams(
            # batch and spatial-half are independent (megacore on v7x);
            # spatial tiles within a half are a reduction.
            dimension_semantics=("parallel", "parallel", "arbitrary"),
            # explicit limit: safe headroom for tile_r=512 temporaries on v5e's
            # 16 MiB default scoped VMEM, well under physical VMEM everywhere.
            vmem_limit_bytes=32 * 1024 * 1024,
        ),
    )(pred_t, ref_t)

    per_image = jnp.sum(partial, axis=(1, 2, 3)) / (3.0 * HW)   # (B,)
    return (loss_weight * jnp.mean(per_image)).astype(jnp.float32)


def _reference_loss(pred, ref, loss_weight=1.0):
    """Pure-JAX reference (same analytic Lab formula, jnp.cbrt)."""
    def to_lab(x):
        u = jnp.floor(jnp.clip((x + 1.0) * 0.5, 0.0, 1.0) * 255.0)
        r, g, b = u[:, 0], u[:, 1], u[:, 2]
        X = _XR * r + _XG * g + _XB * b
        Y = _YR * r + _YG * g + _YB * b
        Z = _ZR * r + _ZG * g + _ZB * b

        def f(t):
            return jnp.where(t > _THRESH, jnp.cbrt(t), 7.787 * t + 16.0 / 116.0)

        fx, fy, fz = f(X), f(Y), f(Z)
        L = jnp.where(Y > _THRESH, 116.0 * fy - 16.0, 903.3 * Y)
        a = 500.0 * (fx - fy) + 128.0
        bb = 200.0 * (fy - fz) + 128.0
        return (jnp.clip(jnp.round(L * (255.0 / 100.0)), 0.0, 255.0),
                jnp.clip(jnp.round(a), 0.0, 255.0),
                jnp.clip(jnp.round(bb), 0.0, 255.0))

    pL, pa, pb = to_lab(pred)
    rL, ra, rb = to_lab(ref)
    diff = (jnp.abs(pL - rL) + jnp.abs(pa - ra) + jnp.abs(pb - rb)) / 3.0
    return loss_weight * jnp.mean(jnp.mean(diff, axis=(1, 2)))


if __name__ == "__main__":
    key = jax.random.PRNGKey(0)
    k1, k2, k3, k4 = jax.random.split(key, 4)

    # Case 1: small canonical shape (B=2, C=3, 16x16) -> single-tile path.
    B, C, H, W = 2, 3, 16, 16
    pred = jnp.tanh(jax.random.normal(k1, (B, C, H, W), dtype=jnp.float32))
    ref = jnp.tanh(jax.random.normal(k2, (B, C, H, W), dtype=jnp.float32))
    loss = color_correction_loss(pred, ref, loss_weight=1.0)
    jax.block_until_ready(loss)
    ref_loss = float(_reference_loss(pred, ref, loss_weight=1.0))
    assert abs(float(loss) - ref_loss) < 5e-2 * max(1.0, abs(ref_loss)), (
        float(loss), ref_loss)

    # Case 2: 48x48 -> exercises the spatial-half split + in-kernel tail mask
    # (rows=18, tile_r=16, last tile partial), still with zero host-side padding.
    H2 = W2 = 48
    pred2 = jnp.tanh(jax.random.normal(k3, (1, C, H2, W2), dtype=jnp.float32))
    ref2 = jnp.tanh(jax.random.normal(k4, (1, C, H2, W2), dtype=jnp.float32))
    loss2 = color_correction_loss(pred2, ref2, loss_weight=1.0)
    jax.block_until_ready(loss2)
    ref_loss2 = float(_reference_loss(pred2, ref2, loss_weight=1.0))
    assert abs(float(loss2) - ref_loss2) < 5e-2 * max(1.0, abs(ref_loss2)), (
        float(loss2), ref_loss2)

    print("KERNEL_OK")
</pallas_src>

<mosaic_0001>
module attributes {stable_mosaic.version = 11 : i64} {
  func.func @kernel(%arg0: i32, %arg1: i32, %arg2: i32, %arg3: memref<1x3x2x128xf32, #tpu.memory_space<vmem>>, %arg4: memref<1x3x2x128xf32, #tpu.memory_space<vmem>>, %arg5: memref<1x1x1x128xf32, #tpu.memory_space<vmem>>) attributes {dimension_semantics = [#tpu.dimension_semantics<parallel>, #tpu.dimension_semantics<parallel>, #tpu.dimension_semantics<arbitrary>], iteration_bounds = array<i64: 2, 1, 1>, scalar_prefetch = 0 : i64, scratch_operands = 0 : i64, tpu.core_type = #tpu.core_type<tc>, window_params = [{transform_indices = @transform_0, window_bounds = array<i64: 1, 3, 2, 128>}, {transform_indices = @transform_1, window_bounds = array<i64: 1, 3, 2, 128>}, {transform_indices = @transform_2, window_bounds = array<i64: 1, 1, 1, 128>}]} {
    %c0_i32 = arith.constant 0 : i32
    %0 = arith.cmpi eq, %arg2, %c0_i32 : i32
    %1 = arith.extui %0 : i1 to i32
    %c0_i32_0 = arith.constant 0 : i32
    %2 = arith.cmpi ne, %1, %c0_i32_0 : i32
    scf.if %2 {
      %cst_108 = arith.constant 0.000000e+00 : f32
      %263 = vector.broadcast %cst_108 : f32 to vector<1x1x1x128xf32>
      %c0_109 = arith.constant 0 : index
      %c0_110 = arith.constant 0 : index
      %c0_111 = arith.constant 0 : index
      %c0_112 = arith.constant 0 : index
      %264 = vector.load %arg5[%c0_109, %c0_110, %c0_111, %c0_112] : memref<1x1x1x128xf32, #tpu.memory_space<vmem>>, vector<1x1x1x128xf32>
      tpu.vector_store %arg5[%c0_109, %c0_110, %c0_111, %c0_112], %263 {strides = array<i32>} : memref<1x1x1x128xf32, #tpu.memory_space<vmem>>, vector<1x1x1x128xf32>,
    } else {
    }
    %c0 = arith.constant 0 : index
    %c0_1 = arith.constant 0 : index
    %c0_2 = arith.constant 0 : index
    %c0_3 = arith.constant 0 : index
    %3 = vector.load %arg3[%c0, %c0_1, %c0_2, %c0_3] : memref<1x3x2x128xf32, #tpu.memory_space<vmem>>, vector<1x3x2x128xf32>
    %c0_4 = arith.constant 0 : index
    %c0_5 = arith.constant 0 : index
    %c0_6 = arith.constant 0 : index
    %c0_7 = arith.constant 0 : index
    %4 = vector.load %arg4[%c0_4, %c0_5, %c0_6, %c0_7] : memref<1x3x2x128xf32, #tpu.memory_space<vmem>>, vector<1x3x2x128xf32>
    %5 = vector.extract_strided_slice %3 {offsets = [0, 0, 0, 0], sizes = [1, 1, 2, 128], strides = [1, 1, 1, 1]} : vector<1x3x2x128xf32> to vector<1x1x2x128xf32>
    %6 = vector.shape_cast %5 : vector<1x1x2x128xf32> to vector<2x128xf32>
    %cst = arith.constant 1.275000e+02 : f32
    %7 = vector.broadcast %cst : f32 to vector<2x128xf32>
    %8 = arith.mulf %6, %7 : vector<2x128xf32>
    %cst_8 = arith.constant 1.275000e+02 : f32
    %9 = vector.broadcast %cst_8 : f32 to vector<2x128xf32>
    %10 = arith.addf %8, %9 : vector<2x128xf32>
    %cst_9 = arith.constant 0.000000e+00 : f32
    %cst_10 = arith.constant 2.550000e+02 : f32
    %11 = vector.broadcast %cst_9 : f32 to vector<2x128xf32>
    %12 = arith.maximumf %11, %10 : vector<2x128xf32>
    %13 = vector.broadcast %cst_10 : f32 to vector<2x128xf32>
    %14 = arith.minimumf %13, %12 : vector<2x128xf32>
    %15 = math.floor %14 : vector<2x128xf32>
    %16 = vector.extract_strided_slice %3 {offsets = [0, 1, 0, 0], sizes = [1, 1, 2, 128], strides = [1, 1, 1, 1]} : vector<1x3x2x128xf32> to vector<1x1x2x128xf32>
    %17 = vector.shape_cast %16 : vector<1x1x2x128xf32> to vector<2x128xf32>
    %cst_11 = arith.constant 1.275000e+02 : f32
    %18 = vector.broadcast %cst_11 : f32 to vector<2x128xf32>
    %19 = arith.mulf %17, %18 : vector<2x128xf32>
    %cst_12 = arith.constant 1.275000e+02 : f32
    %20 = vector.broadcast %cst_12 : f32 to vector<2x128xf32>
    %21 = arith.addf %19, %20 : vector<2x128xf32>
    %cst_13 = arith.constant 0.000000e+00 : f32
    %cst_14 = arith.constant 2.550000e+02 : f32
    %22 = vector.broadcast %cst_13 : f32 to vector<2x128xf32>
    %23 = arith.maximumf %22, %21 : vector<2x128xf32>
    %24 = vector.broadcast %cst_14 : f32 to vector<2x128xf32>
    %25 = arith.minimumf %24, %23 : vector<2x128xf32>
    %26 = math.floor %25 : vector<2x128xf32>
    %27 = vector.extract_strided_slice %3 {offsets = [0, 2, 0, 0], sizes = [1, 1, 2, 128], strides = [1, 1, 1, 1]} : vector<1x3x2x128xf32> to vector<1x1x2x128xf32>
    %28 = vector.shape_cast %27 : vector<1x1x2x128xf32> to vector<2x128xf32>
    %cst_15 = arith.constant 1.275000e+02 : f32
    %29 = vector.broadcast %cst_15 : f32 to vector<2x128xf32>
    %30 = arith.mulf %28, %29 : vector<2x128xf32>
    %cst_16 = arith.constant 1.275000e+02 : f32
    %31 = vector.broadcast %cst_16 : f32 to vector<2x128xf32>
    %32 = arith.addf %30, %31 : vector<2x128xf32>
    %cst_17 = arith.constant 0.000000e+00 : f32
    %cst_18 = arith.constant 2.550000e+02 : f32
    %33 = vector.broadcast %cst_17 : f32 to vector<2x128xf32>
    %34 = arith.maximumf %33, %32 : vector<2x128xf32>
    %35 = vector.broadcast %cst_18 : f32 to vector<2x128xf32>
    %36 = arith.minimumf %35, %34 : vector<2x128xf32>
    %37 = math.floor %36 : vector<2x128xf32>
    %cst_19 = arith.constant 0.00170177547 : f32
    %38 = vector.broadcast %cst_19 : f32 to vector<2x128xf32>
    %39 = arith.mulf %38, %15 : vector<2x128xf32>
    %cst_20 = arith.constant 0.00147537026 : f32
    %40 = vector.broadcast %cst_20 : f32 to vector<2x128xf32>
    %41 = arith.mulf %40, %26 : vector<2x128xf32>
    %42 = arith.addf %39, %41 : vector<2x128xf32>
    %cst_21 = arith.constant 7.44422839E-4 : f32
    %43 = vector.broadcast %cst_21 : f32 to vector<2x128xf32>
    %44 = arith.mulf %43, %37 : vector<2x128xf32>
    %45 = arith.addf %42, %44 : vector<2x128xf32>
    %cst_22 = arith.constant 8.34003905E-4 : f32
    %46 = vector.broadcast %cst_22 : f32 to vector<2x128xf32>
    %47 = arith.mulf %46, %15 : vector<2x128xf32>
    %cst_23 = arith.constant 0.00280454895 : f32
    %48 = vector.broadcast %cst_23 : f32 to vector<2x128xf32>
    %49 = arith.mulf %48, %26 : vector<2x128xf32>
    %50 = arith.addf %47, %49 : vector<2x128xf32>
    %cst_24 = arith.constant 2.83015688E-4 : f32
    %51 = vector.broadcast %cst_24 : f32 to vector<2x128xf32>
    %52 = arith.mulf %51, %37 : vector<2x128xf32>
    %53 = arith.addf %50, %52 : vector<2x128xf32>
    %cst_25 = arith.constant 6.96388815E-5 : f32
    %54 = vector.broadcast %cst_25 : f32 to vector<2x128xf32>
    %55 = arith.mulf %54, %15 : vector<2x128xf32>
    %cst_26 = arith.constant 4.29319683E-4 : f32
    %56 = vector.broadcast %cst_26 : f32 to vector<2x128xf32>
    %57 = arith.mulf %56, %26 : vector<2x128xf32>
    %58 = arith.addf %55, %57 : vector<2x128xf32>
    %cst_27 = arith.constant 3.422610e-03 : f32
    %59 = vector.broadcast %cst_27 : f32 to vector<2x128xf32>
    %60 = arith.mulf %59, %37 : vector<2x128xf32>
    %61 = arith.addf %58, %60 : vector<2x128xf32>
    %cst_28 = arith.constant 8.856000e-03 : f32
    %62 = vector.broadcast %cst_28 : f32 to vector<2x128xf32>
    %63 = arith.cmpf ogt, %45, %62 : vector<2x128xf32>
    %64 = math.log %45 : vector<2x128xf32>
    %cst_29 = arith.constant 0.333333343 : f32
    %65 = vector.broadcast %cst_29 : f32 to vector<2x128xf32>
    %66 = arith.mulf %64, %65 : vector<2x128xf32>
    %67 = math.exp %66 : vector<2x128xf32>
    %cst_30 = arith.constant 7.787000e+00 : f32
    %68 = vector.broadcast %cst_30 : f32 to vector<2x128xf32>
    %69 = arith.mulf %68, %45 : vector<2x128xf32>
    %cst_31 = arith.constant 0.137931034 : f32
    %70 = vector.broadcast %cst_31 : f32 to vector<2x128xf32>
    %71 = arith.addf %69, %70 : vector<2x128xf32>
    %72 = arith.select %63, %67, %71 : vector<2x128xi1>, vector<2x128xf32>
    %cst_32 = arith.constant 8.856000e-03 : f32
    %73 = vector.broadcast %cst_32 : f32 to vector<2x128xf32>
    %74 = arith.cmpf ogt, %53, %73 : vector<2x128xf32>
    %75 = math.log %53 : vector<2x128xf32>
    %cst_33 = arith.constant 0.333333343 : f32
    %76 = vector.broadcast %cst_33 : f32 to vector<2x128xf32>
    %77 = arith.mulf %75, %76 : vector<2x128xf32>
    %78 = math.exp %77 : vector<2x128xf32>
    %cst_34 = arith.constant 7.787000e+00 : f32
    %79 = vector.broadcast %cst_34 : f32 to vector<2x128xf32>
    %80 = arith.mulf %79, %53 : vector<2x128xf32>
    %cst_35 = arith.constant 0.137931034 : f32
    %81 = vector.broadcast %cst_35 : f32 to vector<2x128xf32>
    %82 = arith.addf %80, %81 : vector<2x128xf32>
    %83 = arith.select %74, %78, %82 : vector<2x128xi1>, vector<2x128xf32>
    %cst_36 = arith.constant 8.856000e-03 : f32
    %84 = vector.broadcast %cst_36 : f32 to vector<2x128xf32>
    %85 = arith.cmpf ogt, %61, %84 : vector<2x128xf32>
    %86 = math.log %61 : vector<2x128xf32>
    %cst_37 = arith.constant 0.333333343 : f32
    %87 = vector.broadcast %cst_37 : f32 to vector<2x128xf32>
    %88 = arith.mulf %86, %87 : vector<2x128xf32>
    %89 = math.exp %88 : vector<2x128xf32>
    %cst_38 = arith.constant 7.787000e+00 : f32
    %90 = vector.broadcast %cst_38 : f32 to vector<2x128xf32>
    %91 = arith.mulf %90, %61 : vector<2x128xf32>
    %cst_39 = arith.constant 0.137931034 : f32
    %92 = vector.broadcast %cst_39 : f32 to vector<2x128xf32>
    %93 = arith.addf %91, %92 : vector<2x128xf32>
    %94 = arith.select %85, %89, %93 : vector<2x128xi1>, vector<2x128xf32>
    %cst_40 = arith.constant 8.856000e-03 : f32
    %95 = vector.broadcast %cst_40 : f32 to vector<2x128xf32>
    %96 = arith.cmpf ogt, %53, %95 : vector<2x128xf32>
    %cst_41 = arith.constant 1.160000e+02 : f32
    %97 = vector.broadcast %cst_41 : f32 to vector<2x128xf32>
    %98 = arith.mulf %97, %83 : vector<2x128xf32>
    %cst_42 = arith.constant 1.600000e+01 : f32
    %99 = vector.broadcast %cst_42 : f32 to vector<2x128xf32>
    %100 = arith.subf %98, %99 : vector<2x128xf32>
    %cst_43 = arith.constant 903.299987 : f32
    %101 = vector.broadcast %cst_43 : f32 to vector<2x128xf32>
    %102 = arith.mulf %101, %53 : vector<2x128xf32>
    %103 = arith.select %96, %100, %102 : vector<2x128xi1>, vector<2x128xf32>
    %104 = arith.subf %72, %83 : vector<2x128xf32>
    %cst_44 = arith.constant 5.000000e+02 : f32
    %105 = vector.broadcast %cst_44 : f32 to vector<2x128xf32>
    %106 = arith.mulf %105, %104 : vector<2x128xf32>
    %cst_45 = arith.constant 1.280000e+02 : f32
    %107 = vector.broadcast %cst_45 : f32 to vector<2x128xf32>
    %108 = arith.addf %106, %107 : vector<2x128xf32>
    %109 = arith.subf %83, %94 : vector<2x128xf32>
    %cst_46 = arith.constant 2.000000e+02 : f32
    %110 = vector.broadcast %cst_46 : f32 to vector<2x128xf32>
    %111 = arith.mulf %110, %109 : vector<2x128xf32>
    %cst_47 = arith.constant 1.280000e+02 : f32
    %112 = vector.broadcast %cst_47 : f32 to vector<2x128xf32>
    %113 = arith.addf %111, %112 : vector<2x128xf32>
    %cst_48 = arith.constant 2.550000e+00 : f32
    %114 = vector.broadcast %cst_48 : f32 to vector<2x128xf32>
    %115 = arith.mulf %103, %114 : vector<2x128xf32>
    %116 = math.roundeven %115 : vector<2x128xf32>
    %117 = math.roundeven %108 : vector<2x128xf32>
    %cst_49 = arith.constant 0.000000e+00 : f32
    %cst_50 = arith.constant 2.550000e+02 : f32
    %118 = vector.broadcast %cst_49 : f32 to vector<2x128xf32>
    %119 = arith.maximumf %118, %117 : vector<2x128xf32>
    %120 = vector.broadcast %cst_50 : f32 to vector<2x128xf32>
    %121 = arith.minimumf %120, %119 : vector<2x128xf32>
    %122 = math.roundeven %113 : vector<2x128xf32>
    %cst_51 = arith.constant 0.000000e+00 : f32
    %cst_52 = arith.constant 2.550000e+02 : f32
    %123 = vector.broadcast %cst_51 : f32 to vector<2x128xf32>
    %124 = arith.maximumf %123, %122 : vector<2x128xf32>
    %125 = vector.broadcast %cst_52 : f32 to vector<2x128xf32>
    %126 = arith.minimumf %125, %124 : vector<2x128xf32>
    %127 = vector.extract_strided_slice %4 {offsets = [0, 0, 0, 0], sizes = [1, 1, 2, 128], strides = [1, 1, 1, 1]} : vector<1x3x2x128xf32> to vector<1x1x2x128xf32>
    %128 = vector.shape_cast %127 : vector<1x1x2x128xf32> to vector<2x128xf32>
    %cst_53 = arith.constant 1.275000e+02 : f32
    %129 = vector.broadcast %cst_53 : f32 to vector<2x128xf32>
    %130 = arith.mulf %128, %129 : vector<2x128xf32>
    %cst_54 = arith.constant 1.275000e+02 : f32
    %131 = vector.broadcast %cst_54 : f32 to vector<2x128xf32>
    %132 = arith.addf %130, %131 : vector<2x128xf32>
    %cst_55 = arith.constant 0.000000e+00 : f32
    %cst_56 = arith.constant 2.550000e+02 : f32
    %133 = vector.broadcast %cst_55 : f32 to vector<2x128xf32>
    %134 = arith.maximumf %133, %132 : vector<2x128xf32>
    %135 = vector.broadcast %cst_56 : f32 to vector<2x128xf32>
    %136 = arith.minimumf %135, %134 : vector<2x128xf32>
    %137 = math.floor %136 : vector<2x128xf32>
    %138 = vector.extract_strided_slice %4 {offsets = [0, 1, 0, 0], sizes = [1, 1, 2, 128], strides = [1, 1, 1, 1]} : vector<1x3x2x128xf32> to vector<1x1x2x128xf32>
    %139 = vector.shape_cast %138 : vector<1x1x2x128xf32> to vector<2x128xf32>
    %cst_57 = arith.constant 1.275000e+02 : f32
    %140 = vector.broadcast %cst_57 : f32 to vector<2x128xf32>
    %141 = arith.mulf %139, %140 : vector<2x128xf32>
    %cst_58 = arith.constant 1.275000e+02 : f32
    %142 = vector.broadcast %cst_58 : f32 to vector<2x128xf32>
    %143 = arith.addf %141, %142 : vector<2x128xf32>
    %cst_59 = arith.constant 0.000000e+00 : f32
    %cst_60 = arith.constant 2.550000e+02 : f32
    %144 = vector.broadcast %cst_59 : f32 to vector<2x128xf32>
    %145 = arith.maximumf %144, %143 : vector<2x128xf32>
    %146 = vector.broadcast %cst_60 : f32 to vector<2x128xf32>
    %147 = arith.minimumf %146, %145 : vector<2x128xf32>
    %148 = math.floor %147 : vector<2x128xf32>
    %149 = vector.extract_strided_slice %4 {offsets = [0, 2, 0, 0], sizes = [1, 1, 2, 128], strides = [1, 1, 1, 1]} : vector<1x3x2x128xf32> to vector<1x1x2x128xf32>
    %150 = vector.shape_cast %149 : vector<1x1x2x128xf32> to vector<2x128xf32>
    %cst_61 = arith.constant 1.275000e+02 : f32
    %151 = vector.broadcast %cst_61 : f32 to vector<2x128xf32>
    %152 = arith.mulf %150, %151 : vector<2x128xf32>
    %cst_62 = arith.constant 1.275000e+02 : f32
    %153 = vector.broadcast %cst_62 : f32 to vector<2x128xf32>
    %154 = arith.addf %152, %153 : vector<2x128xf32>
    %cst_63 = arith.constant 0.000000e+00 : f32
    %cst_64 = arith.constant 2.550000e+02 : f32
    %155 = vector.broadcast %cst_63 : f32 to vector<2x128xf32>
    %156 = arith.maximumf %155, %154 : vector<2x128xf32>
    %157 = vector.broadcast %cst_64 : f32 to vector<2x128xf32>
    %158 = arith.minimumf %157, %156 : vector<2x128xf32>
    %159 = math.floor %158 : vector<2x128xf32>
    %cst_65 = arith.constant 0.00170177547 : f32
    %160 = vector.broadcast %cst_65 : f32 to vector<2x128xf32>
    %161 = arith.mulf %160, %137 : vector<2x128xf32>
    %cst_66 = arith.constant 0.00147537026 : f32
    %162 = vector.broadcast %cst_66 : f32 to vector<2x128xf32>
    %163 = arith.mulf %162, %148 : vector<2x128xf32>
    %164 = arith.addf %161, %163 : vector<2x128xf32>
    %cst_67 = arith.constant 7.44422839E-4 : f32
    %165 = vector.broadcast %cst_67 : f32 to vector<2x128xf32>
    %166 = arith.mulf %165, %159 : vector<2x128xf32>
    %167 = arith.addf %164, %166 : vector<2x128xf32>
    %cst_68 = arith.constant 8.34003905E-4 : f32
    %168 = vector.broadcast %cst_68 : f32 to vector<2x128xf32>
    %169 = arith.mulf %168, %137 : vector<2x128xf32>
    %cst_69 = arith.constant 0.00280454895 : f32
    %170 = vector.broadcast %cst_69 : f32 to vector<2x128xf32>
    %171 = arith.mulf %170, %148 : vector<2x128xf32>
    %172 = arith.addf %169, %171 : vector<2x128xf32>
    %cst_70 = arith.constant 2.83015688E-4 : f32
    %173 = vector.broadcast %cst_70 : f32 to vector<2x128xf32>
    %174 = arith.mulf %173, %159 : vector<2x128xf32>
    %175 = arith.addf %172, %174 : vector<2x128xf32>
    %cst_71 = arith.constant 6.96388815E-5 : f32
    %176 = vector.broadcast %cst_71 : f32 to vector<2x128xf32>
    %177 = arith.mulf %176, %137 : vector<2x128xf32>
    %cst_72 = arith.constant 4.29319683E-4 : f32
    %178 = vector.broadcast %cst_72 : f32 to vector<2x128xf32>
    %179 = arith.mulf %178, %148 : vector<2x128xf32>
    %180 = arith.addf %177, %179 : vector<2x128xf32>
    %cst_73 = arith.constant 3.422610e-03 : f32
    %181 = vector.broadcast %cst_73 : f32 to vector<2x128xf32>
    %182 = arith.mulf %181, %159 : vector<2x128xf32>
    %183 = arith.addf %180, %182 : vector<2x128xf32>
    %cst_74 = arith.constant 8.856000e-03 : f32
    %184 = vector.broadcast %cst_74 : f32 to vector<2x128xf32>
    %185 = arith.cmpf ogt, %167, %184 : vector<2x128xf32>
    %186 = math.log %167 : vector<2x128xf32>
    %cst_75 = arith.constant 0.333333343 : f32
    %187 = vector.broadcast %cst_75 : f32 to vector<2x128xf32>
    %188 = arith.mulf %186, %187 : vector<2x128xf32>
    %189 = math.exp %188 : vector<2x128xf32>
    %cst_76 = arith.constant 7.787000e+00 : f32
    %190 = vector.broadcast %cst_76 : f32 to vector<2x128xf32>
    %191 = arith.mulf %190, %167 : vector<2x128xf32>
    %cst_77 = arith.constant 0.137931034 : f32
    %192 = vector.broadcast %cst_77 : f32 to vector<2x128xf32>
    %193 = arith.addf %191, %192 : vector<2x128xf32>
    %194 = arith.select %185, %189, %193 : vector<2x128xi1>, vector<2x128xf32>
    %cst_78 = arith.constant 8.856000e-03 : f32
    %195 = vector.broadcast %cst_78 : f32 to vector<2x128xf32>
    %196 = arith.cmpf ogt, %175, %195 : vector<2x128xf32>
    %197 = math.log %175 : vector<2x128xf32>
    %cst_79 = arith.constant 0.333333343 : f32
    %198 = vector.broadcast %cst_79 : f32 to vector<2x128xf32>
    %199 = arith.mulf %197, %198 : vector<2x128xf32>
    %200 = math.exp %199 : vector<2x128xf32>
    %cst_80 = arith.constant 7.787000e+00 : f32
    %201 = vector.broadcast %cst_80 : f32 to vector<2x128xf32>
    %202 = arith.mulf %201, %175 : vector<2x128xf32>
    %cst_81 = arith.constant 0.137931034 : f32
    %203 = vector.broadcast %cst_81 : f32 to vector<2x128xf32>
    %204 = arith.addf %202, %203 : vector<2x128xf32>
    %205 = arith.select %196, %200, %204 : vector<2x128xi1>, vector<2x128xf32>
    %cst_82 = arith.constant 8.856000e-03 : f32
    %206 = vector.broadcast %cst_82 : f32 to vector<2x128xf32>
    %207 = arith.cmpf ogt, %183, %206 : vector<2x128xf32>
    %208 = math.log %183 : vector<2x128xf32>
    %cst_83 = arith.constant 0.333333343 : f32
    %209 = vector.broadcast %cst_83 : f32 to vector<2x128xf32>
    %210 = arith.mulf %208, %209 : vector<2x128xf32>
    %211 = math.exp %210 : vector<2x128xf32>
    %cst_84 = arith.constant 7.787000e+00 : f32
    %212 = vector.broadcast %cst_84 : f32 to vector<2x128xf32>
    %213 = arith.mulf %212, %183 : vector<2x128xf32>
    %cst_85 = arith.constant 0.137931034 : f32
    %214 = vector.broadcast %cst_85 : f32 to vector<2x128xf32>
    %215 = arith.addf %213, %214 : vector<2x128xf32>
    %216 = arith.select %207, %211, %215 : vector<2x128xi1>, vector<2x128xf32>
    %cst_86 = arith.constant 8.856000e-03 : f32
    %217 = vector.broadcast %cst_86 : f32 to vector<2x128xf32>
    %218 = arith.cmpf ogt, %175, %217 : vector<2x128xf32>
    %cst_87 = arith.constant 1.160000e+02 : f32
    %219 = vector.broadcast %cst_87 : f32 to vector<2x128xf32>
    %220 = arith.mulf %219, %205 : vector<2x128xf32>
    %cst_88 = arith.constant 1.600000e+01 : f32
    %221 = vector.broadcast %cst_88 : f32 to vector<2x128xf32>
    %222 = arith.subf %220, %221 : vector<2x128xf32>
    %cst_89 = arith.constant 903.299987 : f32
    %223 = vector.broadcast %cst_89 : f32 to vector<2x128xf32>
    %224 = arith.mulf %223, %175 : vector<2x128xf32>
    %225 = arith.select %218, %222, %224 : vector<2x128xi1>, vector<2x128xf32>
    %226 = arith.subf %194, %205 : vector<2x128xf32>
    %cst_90 = arith.constant 5.000000e+02 : f32
    %227 = vector.broadcast %cst_90 : f32 to vector<2x128xf32>
    %228 = arith.mulf %227, %226 : vector<2x128xf32>
    %cst_91 = arith.constant 1.280000e+02 : f32
    %229 = vector.broadcast %cst_91 : f32 to vector<2x128xf32>
    %230 = arith.addf %228, %229 : vector<2x128xf32>
    %231 = arith.subf %205, %216 : vector<2x128xf32>
    %cst_92 = arith.constant 2.000000e+02 : f32
    %232 = vector.broadcast %cst_92 : f32 to vector<2x128xf32>
    %233 = arith.mulf %232, %231 : vector<2x128xf32>
    %cst_93 = arith.constant 1.280000e+02 : f32
    %234 = vector.broadcast %cst_93 : f32 to vector<2x128xf32>
    %235 = arith.addf %233, %234 : vector<2x128xf32>
    %cst_94 = arith.constant 2.550000e+00 : f32
    %236 = vector.broadcast %cst_94 : f32 to vector<2x128xf32>
    %237 = arith.mulf %225, %236 : vector<2x128xf32>
    %238 = math.roundeven %237 : vector<2x128xf32>
    %239 = math.roundeven %230 : vector<2x128xf32>
    %cst_95 = arith.constant 0.000000e+00 : f32
    %cst_96 = arith.constant 2.550000e+02 : f32
    %240 = vector.broadcast %cst_95 : f32 to vector<2x128xf32>
    %241 = arith.maximumf %240, %239 : vector<2x128xf32>
    %242 = vector.broadcast %cst_96 : f32 to vector<2x128xf32>
    %243 = arith.minimumf %242, %241 : vector<2x128xf32>
    %244 = math.roundeven %235 : vector<2x128xf32>
    %cst_97 = arith.constant 0.000000e+00 : f32
    %cst_98 = arith.constant 2.550000e+02 : f32
    %245 = vector.broadcast %cst_97 : f32 to vector<2x128xf32>
    %246 = arith.maximumf %245, %244 : vector<2x128xf32>
    %247 = vector.broadcast %cst_98 : f32 to vector<2x128xf32>
    %248 = arith.minimumf %247, %246 : vector<2x128xf32>
    %249 = arith.subf %116, %238 : vector<2x128xf32>
    %250 = math.absf %249 : vector<2x128xf32>
    %251 = arith.subf %121, %243 : vector<2x128xf32>
    %252 = math.absf %251 : vector<2x128xf32>
    %253 = arith.addf %250, %252 : vector<2x128xf32>
    %254 = arith.subf %126, %248 : vector<2x128xf32>
    %255 = math.absf %254 : vector<2x128xf32>
    %256 = arith.addf %253, %255 : vector<2x128xf32>
    %c0_99 = arith.constant 0 : index
    %c0_100 = arith.constant 0 : index
    %c0_101 = arith.constant 0 : index
    %c0_102 = arith.constant 0 : index
    %257 = vector.load %arg5[%c0_99, %c0_100, %c0_101, %c0_102] : memref<1x1x1x128xf32, #tpu.memory_space<vmem>>, vector<1x1x1x128xf32>
    %cst_103 = arith.constant dense<0.000000e+00> : vector<128xf32>
    %258 = vector.multi_reduction <add>, %256, %cst_103 [0] : vector<2x128xf32> to vector<128xf32>
    %259 = vector.shape_cast %258 : vector<128xf32> to vector<1x128xf32>
    %260 = vector.shape_cast %259 : vector<1x128xf32> to vector<1x1x1x128xf32>
    %261 = arith.addf %257, %260 : vector<1x1x1x128xf32>
    %c0_104 = arith.constant 0 : index
    %c0_105 = arith.constant 0 : index
    %c0_106 = arith.constant 0 : index
    %c0_107 = arith.constant 0 : index
    %262 = vector.load %arg5[%c0_104, %c0_105, %c0_106, %c0_107] : memref<1x1x1x128xf32, #tpu.memory_space<vmem>>, vector<1x1x1x128xf32>
    tpu.vector_store %arg5[%c0_104, %c0_105, %c0_106, %c0_107], %261 {strides = array<i32>} : memref<1x1x1x128xf32, #tpu.memory_space<vmem>>, vector<1x1x1x128xf32>,
    return
  }
  func.func @transform_0(%arg0: i32, %arg1: i32, %arg2: i32) -> (i32, i32, i32, i32) {
    %c1_i32 = arith.constant 1 : i32
    %0 = arith.muli %arg1, %c1_i32 : i32
    %1 = arith.addi %0, %arg2 : i32
    %c0_i32 = arith.constant 0 : i32
    %c0_i32_0 = arith.constant 0 : i32
    %c0_i32_1 = arith.constant 0 : i32
    return %arg0, %c0_i32, %1, %c0_i32_0 : i32, i32, i32, i32
  }
  func.func @transform_1(%arg0: i32, %arg1: i32, %arg2: i32) -> (i32, i32, i32, i32) {
    %c1_i32 = arith.constant 1 : i32
    %0 = arith.muli %arg1, %c1_i32 : i32
    %1 = arith.addi %0, %arg2 : i32
    %c0_i32 = arith.constant 0 : i32
    %c0_i32_0 = arith.constant 0 : i32
    %c0_i32_1 = arith.constant 0 : i32
    return %arg0, %c0_i32, %1, %c0_i32_0 : i32, i32, i32, i32
  }
  func.func @transform_2(%arg0: i32, %arg1: i32, %arg2: i32) -> (i32, i32, i32, i32) {
    %c0_i32 = arith.constant 0 : i32
    %c0_i32_0 = arith.constant 0 : i32
    %c0_i32_1 = arith.constant 0 : i32
    return %arg0, %arg1, %c0_i32, %c0_i32_0 : i32, i32, i32, i32
  }
}

</mosaic_0001>

<bundles_post_ra>
// kernel: tpu_custom_call.1
= control target key start
LH: loop header
LB: loop body
LE: loop exit
PB: predicated region body
PF: predicated region fallthrough
CT: control target
= control target key end

     0   :  { %7 = vsyncpa [#allocation3], 0  ;;  %s1089_s0 = inlined_call_operand.hbm [shape: f32[2,3,2,128], index: 0, kind: input, shape index: {}]   ;;  %s1090_s1 = inlined_call_operand.hbm [shape: f32[2,3,2,128], index: 1, kind: input, shape index: {}]   ;;  %s1091_s2 = inlined_call_operand.hbm [shape: f32[2,1,1,128], index: 2, kind: output, shape index: {}]  }
   0x1   :  { %9 = vsyncpa [#allocation3 + $0x1], 0 }
   0x2   :  { %10 = vsyncpa [#allocation6], 0 }
   0x3   :  { %12 = vsyncpa [#allocation6 + $0x1], 0 }
   0x4   :  { %13 = vsyncpa [#allocation4], 0 }
   0x5   :  { %15 = vsyncpa [#allocation4 + $0x1], 0  ;;  %s865_s9 = smov 0   ;;  %s867_s10 = smov 0  }
   0x6   :  { %s869_s11 = smov 0   ;;  %s871_s12 = smov 0  }
   0x7   :  { %s873_s13 = smov 0   ;;  %s875_s14 = smov 0  }
   0x8 LB: > { %s541_s15 = sadd.s32 4294967295, %s845_s14   ;;  %s542_s16 = sadd.s32 4294967294, %s845_s14   ;;  %s845_s14 = sphi %s875_s14, %s21_s14   ;;  %s841_s13 = sphi %s873_s13, %s1109_s13   ;;  %s837_s12 = sphi %s871_s12, %s1108_s12   ;;  %s833_s11 = sphi %s869_s11, %s1107_s11   ;;  %s829_s10 = sphi %s867_s10, %s1106_s10   ;;  %s825_s9 = sphi %s865_s9, %s1105_s9  }
   0x9   : > { %s40_s17 = sadd.s32 1, %s841_s13  ;;  %s51_s18 = sadd.s32 1, %s833_s11 }
   0xa   : > { %p42_p0 = scmp.ge.s32.totalorder %s40_s17, 2  ;;  %p58_p1 = scmp.ne.s32.totalorder %s833_s11, %s829_s10 }
   0xb   : > { %p59_p2 = scmp.eq.s32.totalorder %s845_s14, 0  ;;  %p64_p3 = scmp.ne.s32.totalorder %s829_s10, %s825_s9 }
   0xc   : > { %s1111_s17 = smov (%p42_p0, %s40_s17), 0  ;;  %p65_p5 = scmp.eq.s32.totalorder %s541_s15, 0 }
   0xd   : > { %p906_p4 = por %p59_p2, %p58_p1  ;;  %s46_s20 = ssub.s32 %s841_s13, %s1111_s17 }
   0xe   : > { %p120_p6 = scmp.eq.s32.totalorder %s541_s15, 1  ;;  %p49_p7 = scmp.eq.s32.totalorder %s46_s20, 0 }
   0xf   : > { %p912_p8 = por %p65_p5, %p64_p3  ;;  %p126_p10 = scmp.eq.s32.totalorder %s542_s16, 1 }
  0x10   : > { %p916_p9 = por %p120_p6, %p58_p1  ;;  %p544_p12 = scmp.ge.s32.totalorder %s845_s14, 2 }
  0x11   : > { %s921_s23 = scalar_select %p49_p7, %s833_s11, %s51_s18  }
  0x12   : > { %p923_p11 = por %p126_p10, %p64_p3  ;;  %p622_p13 = scmp.lt.s32.totalorder %s845_s14, 2 }
  0x13   : > { %s930_s25 = sand.u32 1, %s833_s11   ;;  %s553_s27 = smul.u32 6, %s841_s13 }
  0x14   : > { %s552_s26 = smul.u32 6, %s930_s25  ;;  %p936_p0 = pnand %p622_p13, %p906_p4 }
  0x15   : > { %s157_s3 = scalar_lea.hbm %s1089_s0, %s553_s27  ;;  %p547_p1 = scmp.ge.s32.totalorder %s845_s14, 1 }
  0x16   : > { %s150_s4 = scalar_lea.vmem [#allocation2], %s552_s26  ;;  %s158_s6 = sshll.u32 %s157_s3, 4  ;;  %s159_s6 = int_to_ptr.hbm [resolvable:$true] %s158_s6 }
  0x17   : > { %s160_s5 = sshll.u32 %s150_s4, 4  ;;  %s147_s7 = scalar_lea.sflag [#allocation3], %s930_s25  ;;  %s161_s5 = int_to_ptr.vmem [resolvable:$true] %s160_s5 }
  0x18   : > { %s847_s8 = smov 32   ;;  %s848_s15 = smov 2  }
  0x19   : > { %614 = dma.hbm_to_vmem [thread:$0]  (!%p936_p0), %s159_s6, 96, %s161_s5, %s147_s7, %s847_s8, %s847_s8, %s848_s15  }
  0x1a   : > { %p192_p2 = scmp.lt.s32.totalorder %s845_s14, 3  ;;  %s181_s19 = scalar_lea.hbm %s1090_s1, %s553_s27 }
  0x1b   : > { %s182_s20 = sshll.u32 %s181_s19, 4  ;;  %s174_s29 = scalar_lea.vmem [#allocation5], %s552_s26  ;;  %s183_s20 = int_to_ptr.hbm [resolvable:$true] %s182_s20 }
  0x1c   : > { %p193_p3 = pnand %p547_p1, %p192_p2  ;;  %s184_s30 = sshll.u32 %s174_s29, 4  ;;  %s185_s30 = int_to_ptr.vmem [resolvable:$true] %s184_s30 }
  0x1d   : > { %s171_s3 = scalar_lea.sflag [#allocation6], %s930_s25  ;;  %s955_s4 = sand.u32 (!%p193_p3), 1, %s829_s10  }
  0x1e   : > { %617 = dma.hbm_to_vmem [thread:$0]  (!%p936_p0), %s183_s20, 96, %s185_s30, %s171_s3, %s847_s8, %s847_s8, %s848_s15  }
  0x1f   : > { %196 = sbr.rel (%p193_p3) target bundleno = 131 (0x83), region = 28  ;;  %s199_s6 = scalar_lea.sflag (!%p193_p3), [#allocation3], %s955_s4 }
  0x20   : > { %s556_s5 = smul.u32 (!%p193_p3), 6, %s955_s4 }
  0x22   : > { %s202_s7 = scalar_lea.vmem (!%p193_p3), [#allocation2], %s556_s5 }
  0x24   : > { %812 = dma.done.wait (%p912_p8), %s199_s6, 96  }
  0x25   : > { %814 = vsyncadd (%p912_p8), %s199_s6, 4294967200  ;;  %s209_s25 = scalar_lea.sflag [#allocation6], %s955_s4  ;;  %s212_s26 = scalar_lea.vmem [#allocation5], %s556_s5 }
  0x26   : > { %816 = dma.done.wait (%p912_p8), %s209_s25, 96  }
  0x27   : > { %818 = vsyncadd (%p912_p8), %s209_s25, 4294967200  ;;  %s969_s27 = scalar_lea.vmem [#allocation7], %s955_s4  ;;  %v849_v0 = vmov 0.0   ;;  %v245_v1 = vld [vmem:[%s202_s7] sm:$0x3]  ;;  %vm410_vm12 = vcmask 1041408   ;;  %s430_s8 = scalar_lea.hbm %s1091_s2, %s837_s12 }
  0x28   : > { %244 = vst [vmem:[%s969_s27] sm:$0x1] %v849_v0  ;;  %v246_v2 = vld [vmem:[%s202_s7 + $0x2] sm:$0x3]  ;;  %v247_v3 = vld [vmem:[%s202_s7 + $0x4] sm:$0x3]  ;;  %v251_v7 = vmul.f32 127.5, %v245_v1 }
  0x29   : > { %v248_v4 = vld [vmem:[%s212_s26] sm:$0x3]  ;;  %v249_v5 = vld [vmem:[%s212_s26 + $0x2] sm:$0x3]  ;;  %v250_v6 = vld [vmem:[%s212_s26 + $0x4] sm:$0x3] }
  0x2a   : > { %v256_v8 = vmul.f32 127.5, %v246_v2  ;;  %v261_v9 = vmul.f32 127.5, %v247_v3  ;;  %v326_v10 = vmul.f32 127.5, %v248_v4  ;;  %v331_v11 = vmul.f32 127.5, %v249_v5  ;;  %s432_s15 = sshll.u32 %s969_s27, 4  ;;  %s434_s16 = sshll.u32 %s430_s8, 4  ;;  %s433_s15 = int_to_ptr.vmem [resolvable:$true] %s432_s15  ;;  %s435_s16 = int_to_ptr.hbm [resolvable:$true] %s434_s16 }
  0x2b   : > { %v336_v12 = vmul.f32 127.5, %v250_v6  ;;  %v252_v13 = vadd.f32 127.5, %v251_v7  ;;  %s421_s18 = scalar_lea.sflag [#allocation4], %s955_s4  ;;  %s773_s19 = sshra.s32 %s435_s16, 4  ;;  %s774_s19 = int_to_ptr.hbm [resolvable:$true] %s773_s19 }
  0x2c   : > { %v257_v14 = vadd.f32 127.5, %v256_v8  ;;  %v262_v15 = vadd.f32 127.5, %v261_v9  ;;  %v327_v16 = vadd.f32 127.5, %v326_v10  ;;  %v332_v17 = vadd.f32 127.5, %v331_v11  ;;  %s775_s20 = scalar_lea.hbm %s774_s19, 1  ;;  %s779_s12 = scalar_lea.hbm %s1091_s2, 2 }
  0x2d   : > { %v337_v18 = vadd.f32 127.5, %v336_v12  ;;  %v253_v19 = vmax.f32 %v252_v13, 0.0  ;;  %p776_p4 = scmp.ne.s32.totalorder %s774_s19, %s775_s20  ;;  %p780_p7 = scmp.lt.s32.totalorder %s774_s19, %s1091_s2 }
  0x2e   : > { %v258_v20 = vmax.f32 %v257_v14, 0.0  ;;  %v263_v21 = vmax.f32 %v262_v15, 0.0  ;;  %v328_v22 = vmax.f32 %v327_v16, 0.0  ;;  %v333_v23 = vmax.f32 %v332_v17, 0.0  ;;  %p781_p8 = scmp.lt.s32.totalorder %s779_s12, %s775_s20 }
  0x2f   : > { %v338_v24 = vmax.f32 %v337_v18, 0.0  ;;  %v254_v25 = vmin.f32 %v253_v19, 255.0  ;;  %p777_p5 = pnand %p776_p4, %p916_p9 }
  0x30   : > { %v259_v26 = vmin.f32 %v258_v20, 255.0  ;;  %v264_v27 = vmin.f32 %v263_v21, 255.0  ;;  %v329_v28 = vmin.f32 %v328_v22, 255.0  ;;  %v334_v29 = vmin.f32 %v333_v23, 255.0  ;;  %p782_p10 = por %p781_p8, %p780_p7 }
  0x31   : > { %v339_v30 = vmin.f32 %v338_v24, 255.0  ;;  %v255_v31 = vfloor.f32 %v254_v25  ;;  %p778_p6 = pneg %p777_p5 }
  0x32   : > { %v260_v32 = vfloor.f32 %v259_v26  ;;  %v265_v33 = vfloor.f32 %v264_v27  ;;  %v330_v34 = vfloor.f32 %v329_v28  ;;  %v335_v35 = vfloor.f32 %v334_v29 }
  0x33   : > { %v266_v36 = vmul.f32 0.0017017755, %v255_v31  ;;  %v340_v39 = vfloor.f32 %v339_v30  ;;  %v271_v40 = vmul.f32 0.0008340039, %v255_v31  ;;  %v276_v44 = vmul.f32 6.963888e-05, %v255_v31  ;;  %p783_p13 = pnand %p782_p10, %p778_p6 }
  0x34   : > { %v267_v37 = vmul.f32 0.0014753703, %v260_v32  ;;  %v269_v38 = vmul.f32 0.00074442284, %v265_v33  ;;  %v272_v41 = vmul.f32 0.002804549, %v260_v32 }
  0x35   : > { %v274_v42 = vmul.f32 0.0002830157, %v265_v33  ;;  %v277_v45 = vmul.f32 0.00042931968, %v260_v32  ;;  %v279_v46 = vmul.f32 0.00342261, %v265_v33 }
  0x36   : > { %v268_v43 = vadd.f32 %v267_v37, %v266_v36  ;;  %v273_v47 = vadd.f32 %v272_v41, %v271_v40  ;;  %v341_v48 = vmul.f32 0.0017017755, %v330_v34  ;;  %v342_v49 = vmul.f32 0.0014753703, %v335_v35 }
  0x37   : > { %v278_v51 = vadd.f32 %v277_v45, %v276_v44  ;;  %v344_v52 = vmul.f32 0.00074442284, %v340_v39  ;;  %v346_v55 = vmul.f32 0.0008340039, %v330_v34  ;;  %v347_v56 = vmul.f32 0.002804549, %v335_v35 }
  0x38   : > { %v972_v50 = vadd.f32 %v269_v38, %v268_v43  ;;  %v974_v53 = vadd.f32 %v274_v42, %v273_v47  ;;  %v343_v54 = vadd.f32 %v342_v49, %v341_v48  ;;  %v349_v58 = vmul.f32 0.0002830157, %v340_v39 }
  0x39   : > { %v976_v57 = vadd.f32 %v279_v46, %v278_v51  ;;  %v351_v59 = vmul.f32 6.963888e-05, %v330_v34  ;;  %v348_v61 = vadd.f32 %v347_v56, %v346_v55  ;;  %v352_v62 = vmul.f32 0.00042931968, %v335_v35 }
  0x3a   : > { %675 = vlog2.f32 %v972_v50  ;;  %v981_v60 = vadd.f32 %v344_v52, %v343_v54  ;;  %v354_v63 = vmul.f32 0.00342261, %v340_v39  ;;  %v287_v13 = vmul.f32 7.787, %v972_v50 }
  0x3b   : > { %677 = vlog2.f32 %v974_v53  ;;  %v983_v0 = vadd.f32 %v349_v58, %v348_v61  ;;  %v353_v1 = vadd.f32 %v352_v62, %v351_v59  ;;  %v296_v18 = vmul.f32 7.787, %v974_v53 }
  0x3c   : > { %679 = vlog2.f32 %v976_v57  ;;  %v305_v20 = vmul.f32 7.787, %v976_v57  ;;  %v288_v24 = vadd.f32 0.13793103, %v287_v13  ;;  %vm281_vm0 = vcmp.gt.f32.partialorder %v972_v50, 0.008856 }
  0x3d   : > { %681 = vlog2.f32 %v981_v60  ;;  %v986_v5 = vadd.f32 %v354_v63, %v353_v1  ;;  %vm290_vm1 = vcmp.gt.f32.partialorder %v974_v53, 0.008856  ;;  %v297_v28 = vadd.f32 0.13793103, %v296_v18 }
  0x3e   : > { %683 = vlog2.f32 %v983_v0  ;;  %v306_v29 = vadd.f32 0.13793103, %v305_v20  ;;  %vm299_vm2 = vcmp.gt.f32.partialorder %v976_v57, 0.008856  ;;  %v371_v33 = vmul.f32 7.787, %v983_v0 }
  0x3f   : > { %685 = vlog2.f32 %v986_v5  ;;  %v310_v39 = vmul.f32 903.3, %v974_v53  ;;  %v362_v40 = vmul.f32 7.787, %v981_v60  ;;  %v380_v46 = vmul.f32 7.787, %v986_v5 }
  0x40   : > { %v676_v2 = vpop.eup %675  ;;  %v372_v45 = vadd.f32 0.13793103, %v371_v33  ;;  %vm365_vm3 = vcmp.gt.f32.partialorder %v983_v0, 0.008856  ;;  %vm356_vm4 = vcmp.gt.f32.partialorder %v981_v60, 0.008856 }
  0x41   : > { %v678_v3 = vpop.eup %677  ;;  %v283_v4 = vmul.f32 0.6931472, %v676_v2  ;;  %v363_v51 = vadd.f32 0.13793103, %v362_v40  ;;  %v381_v59 = vadd.f32 0.13793103, %v380_v46 }
  0x42   : > { %v680_v6 = vpop.eup %679  ;;  %v292_v7 = vmul.f32 0.6931472, %v678_v3  ;;  %vm374_vm5 = vcmp.gt.f32.partialorder %v986_v5, 0.008856  ;;  %v385_v60 = vmul.f32 903.3, %v983_v0 }
  0x43   : > { %v284_v8 = vmul.f32 0.33333334, %v283_v4  ;;  %v301_v9 = vmul.f32 0.6931472, %v680_v6  ;;  %v682_v11 = vpop.eup %681 }
  0x44   : > { %v293_v10 = vmul.f32 0.33333334, %v292_v7  ;;  %v358_v16 = vmul.f32 0.6931472, %v682_v11  ;;  %v684_v17 = vpop.eup %683 }
  0x45   : > { %v285_v12 = vmul.f32 1.442695, %v284_v8  ;;  %v302_v14 = vmul.f32 0.33333334, %v301_v9  ;;  %v367_v22 = vmul.f32 0.6931472, %v684_v17  ;;  %v686_v23 = vpop.eup %685 }
  0x46   : > { %v294_v15 = vmul.f32 1.442695, %v293_v10  ;;  %v359_v21 = vmul.f32 0.33333334, %v358_v16  ;;  %v376_v27 = vmul.f32 0.6931472, %v686_v23 }
  0x47   : > { %687 = vpow2.f32 %v285_v12  ;;  %v303_v19 = vmul.f32 1.442695, %v302_v14  ;;  %v368_v26 = vmul.f32 0.33333334, %v367_v22 }
  0x48   : > { %689 = vpow2.f32 %v294_v15  ;;  %v360_v25 = vmul.f32 1.442695, %v359_v21  ;;  %v377_v31 = vmul.f32 0.33333334, %v376_v27 }
  0x49   : > { %691 = vpow2.f32 %v303_v19  ;;  %v369_v30 = vmul.f32 1.442695, %v368_v26 }
  0x4a   : > { %693 = vpow2.f32 %v360_v25  ;;  %v378_v36 = vmul.f32 1.442695, %v377_v31 }
  0x4b   : > { %695 = vpow2.f32 %v369_v30 }
  0x4c   : > { %697 = vpow2.f32 %v378_v36 }
  0x4d   : > { %v688_v32 = vpop.eup %687 }
  0x4e   : > { %v690_v34 = vpop.eup %689  ;;  %v289_v35 = vsel %vm281_vm0, %v688_v32, %v288_v24 }
  0x4f   : > { %v692_v37 = vpop.eup %691  ;;  %v298_v38 = vsel %vm290_vm1, %v690_v34, %v297_v28 }
  0x50   : > { %v307_v41 = vsel %vm299_vm2, %v692_v37, %v306_v29  ;;  %v308_v42 = vmul.f32 116.0, %v298_v38  ;;  %v312_v43 = vsub.f32 %v289_v35, %v298_v38  ;;  %v694_v49 = vpop.eup %693 }
  0x51   : > { %v315_v44 = vsub.f32 %v298_v38, %v307_v41  ;;  %v696_v52 = vpop.eup %695  ;;  %v364_v53 = vsel %vm356_vm4, %v694_v49, %v363_v51 }
  0x52   : > { %v548_v47 = vadd.f32 -16.0, %v308_v42  ;;  %v313_v48 = vmul.f32 500.0, %v312_v43  ;;  %v373_v58 = vsel %vm365_vm3, %v696_v52, %v372_v45  ;;  %v698_v61 = vpop.eup %697 }
  0x53   : > { %v316_v50 = vmul.f32 200.0, %v315_v44  ;;  %v383_v63 = vmul.f32 116.0, %v373_v58  ;;  %v382_v4 = vsel %vm374_vm5, %v698_v61, %v381_v59  ;;  %v387_v9 = vsub.f32 %v364_v53, %v373_v58 }
  0x54   : > { %v311_v54 = vsel %vm290_vm1, %v548_v47, %v310_v39  ;;  %v314_v55 = vadd.f32 128.0, %v313_v48  ;;  %v390_v13 = vsub.f32 %v373_v58, %v382_v4 }
  0x55   : > { %v1006_v56 = vadd.f32 128.0, %v316_v50  ;;  %v1008_v57 = vmul.f32 2.55, %v311_v54  ;;  %v549_v8 = vadd.f32 -16.0, %v383_v63  ;;  %v388_v16 = vmul.f32 500.0, %v387_v9 }
  0x56   : > { %v567_v62 = vcvt.f32.s32 %v314_v55  ;;  %v565_v10 = vand.u32 2147483647, %v314_v55  ;;  %v570_v12 = vand.u32 2147483648, %v314_v55  ;;  %v391_v18 = vmul.f32 200.0, %v390_v13 }
  0x57   : > { %v559_v1 = vcvt.f32.s32 %v1008_v57  ;;  %v575_v3 = vcvt.f32.s32 %v1006_v56  ;;  %v578_v5 = vand.u32 2147483648, %v1006_v56  ;;  %v386_v15 = vsel %vm365_vm3, %v549_v8, %v385_v60 }
  0x58   : > { %v568_v2 = vcvt.s32.f32 %v567_v62  ;;  %v573_v17 = vand.u32 2147483647, %v1006_v56  ;;  %v393_v19 = vmul.f32 2.55, %v386_v15  ;;  %v562_v21 = vand.u32 2147483648, %v1008_v57 }
  0x59   : > { %v560_v6 = vcvt.s32.f32 %v559_v1  ;;  %v576_v7 = vcvt.s32.f32 %v575_v3  ;;  %v389_v22 = vadd.f32 128.0, %v388_v16  ;;  %v392_v24 = vadd.f32 128.0, %v391_v18 }
  0x5a   : > { %v569_v11 = vand.u32 2147483647, %v568_v2  ;;  %v557_v25 = vand.u32 2147483647, %v1008_v57  ;;  %vm1022_vm6 = vcmp.lt.f32.partialorder %v565_v10, 8388608.0  ;;  %v583_v0 = vcvt.f32.s32 %v393_v19 }
  0x5b   : > { %v577_v14 = vand.u32 2147483647, %v576_v7  ;;  %v561_v20 = vand.u32 2147483647, %v560_v6  ;;  %vm1026_vm7 = vcmp.lt.f32.partialorder %v573_v17, 8388608.0  ;;  %v591_v30 = vcvt.f32.s32 %v389_v22 }
  0x5c   : > { %v571_v23 = vor.u32 %v570_v12, %v569_v11  ;;  %v581_v29 = vand.u32 2147483647, %v393_v19  ;;  %v584_v32 = vcvt.s32.f32 %v583_v0  ;;  %v586_v33 = vand.u32 2147483648, %v393_v19 }
  0x5d   : > { %v579_v27 = vor.u32 %v578_v5, %v577_v14  ;;  %v563_v31 = vor.u32 %v562_v21, %v561_v20  ;;  %v589_v34 = vand.u32 2147483647, %v389_v22  ;;  %v592_v36 = vcvt.s32.f32 %v591_v30  ;;  %v409_v5 = vld [vmem:[%s969_s27] sm:$0x1] }
  0x5e   : > { %v572_v35 = vsel %vm1022_vm6, %v571_v23, %v314_v55  ;;  %v594_v37 = vand.u32 2147483648, %v389_v22  ;;  %v599_v38 = vcvt.f32.s32 %v392_v24  ;;  %vm1032_vm8 = vcmp.lt.f32.partialorder %v557_v25, 8388608.0 }
  0x5f   : > { %v580_v40 = vsel %vm1026_vm7, %v579_v27, %v1006_v56  ;;  %v585_v41 = vand.u32 2147483647, %v584_v32  ;;  %v597_v42 = vand.u32 2147483647, %v392_v24  ;;  %vm1039_vm9 = vcmp.lt.f32.partialorder %v581_v29, 8388608.0 }
  0x60   : > { %v593_v44 = vand.u32 2147483647, %v592_v36  ;;  %v600_v45 = vcvt.s32.f32 %v599_v38  ;;  %v602_v46 = vand.u32 2147483648, %v392_v24  ;;  %v321_v47 = vmax.f32 %v572_v35, 0.0 }
  0x61   : > { %v587_v48 = vor.u32 %v586_v33, %v585_v41  ;;  %vm590_vm10 = vcmp.lt.f32.partialorder %v589_v34, 8388608.0  ;;  %v564_v49 = vsel %vm1032_vm8, %v563_v31, %v1008_v57  ;;  %v324_v52 = vmax.f32 %v580_v40, 0.0 }
  0x62   : > { %v595_v50 = vor.u32 %v594_v37, %v593_v44  ;;  %v601_v51 = vand.u32 2147483647, %v600_v45  ;;  %vm598_vm11 = vcmp.lt.f32.partialorder %v597_v42, 8388608.0  ;;  %v322_v58 = vmin.f32 %v321_v47, 255.0 }
  0x63   : > { %v588_v54 = vsel %vm1039_vm9, %v587_v48, %v393_v19  ;;  %v325_v63 = vmin.f32 %v324_v52, 255.0 }
  0x64   : > { %v596_v55 = vsel %vm590_vm10, %v595_v50, %v389_v22  ;;  %v603_v56 = vor.u32 %v602_v46, %v601_v51  ;;  %v401_v61 = vsub.f32 %v564_v49, %v588_v54 }
  0x65   : > { %v396_v59 = vmax.f32 %v596_v55, 0.0 }
  0x66   : > { %v604_v62 = vsel %vm598_vm11, %v603_v56, %v392_v24  ;;  %v402_v57 = vand.u32 2147483647, %v401_v61 }
  0x67   : > { %v397_v1 = vmin.f32 %v396_v59, 255.0  ;;  %v399_v53 = vmax.f32 %v604_v62, 0.0 }
  0x69   : > { %v400_v2 = vmin.f32 %v399_v53, 255.0  ;;  %v403_v3 = vsub.f32 %v322_v58, %v397_v1 }
  0x6b   : > { %v404_v60 = vand.u32 2147483647, %v403_v3  ;;  %v406_v4 = vsub.f32 %v325_v63, %v400_v2 }
  0x6d   : > { %v405_v6 = vadd.f32 %v404_v60, %v402_v57  ;;  %v407_v7 = vand.u32 2147483647, %v406_v4 }
  0x6f   : > { %v408_v8 = vadd.f32 %v407_v7, %v405_v6 }
  0x71   : > { %v411_v9 = vsel %vm410_vm12, %v408_v8, 0.0 }
  0x72   : > { %v412_v10 = vrot.slane %v411_v9, 4 }
  0x74   : > { %v413_v11 = vadd.f32 %v412_v10, %v411_v9 }
  0x76   : > { %v414_v12 = vrot.slane %v413_v11, 2 }
  0x78   : > { %v415_v13 = vadd.f32 %v414_v12, %v413_v11 }
  0x7a   : > { %v416_v14 = vrot.slane %v415_v13, 1 }
  0x7c   : > { %v417_v15 = vadd.f32 %v416_v14, %v415_v13 }
  0x7e   : > { %v418_v16 = vadd.f32 %v417_v15, %v409_v5 }
  0x80   : > { %419 = vst [vmem:[%s969_s27] sm:$0x1] %v418_v16 }
  0x81   : > { %786 = shalt.err (!%p783_p13)
}
  0x82   : > { %609 = dma.vmem_to_hbm [thread:$0]  (%p916_p9), %s433_s15, 16, %s435_s16, %s421_s18  }
  0x83 PF: > { %s446_s4 = sand.u32 1, %s825_s9   ;;  %p619_p0 = pnand %p544_p12, %p923_p11 }
  0x84   : > { %s447_s6 = scalar_lea.sflag [#allocation4], %s446_s4 }
  0x85   : > { %p620_p1 = pneg %p619_p0 }
  0x87   : > { %820 = dma.done.wait (%p620_p1), %s447_s6, 16  }
  0x88   : > { %822 = vsyncadd (%p620_p1), %s447_s6, 4294967280  ;;  %s21_s14 = sadd.s32 1, %s845_s14   ;;  %s1105_s9 = smov %s829_s10 }
  0x89   : > { %p18_p2 = scmp.ge.s32.totalorder %s21_s14, 4   ;;  %s1106_s10 = smov %s833_s11 }
  0x8a   : > { %s1107_s11 = smov %s921_s23  ;;  %s1108_s12 = smov %s841_s13 }
  0x8b   : > { %s1109_s13 = smov %s1111_s17  ;;  %20 = sbr.rel (!%p18_p2) target bundleno = 8 (0x8), region = 90 }
  0x90   :  { %452 = vsyncpa [#allocation3], 1 }
  0x91   :  { %454 = vsyncpa [#allocation3 + $0x1], 1 }
  0x92   :  { %455 = vsyncpa [#allocation6], 1 }
  0x93   :  { %457 = vsyncpa [#allocation6 + $0x1], 1 }
  0x94   :  { %458 = vsyncpa [#allocation4], 1 }
  0x95   :  { %460 = vsyncpa [#allocation4 + $0x1], 1 }

</bundles_post_ra>
